<compile_context>
chip_gen: v6e
topology: v6e:2x2x1
jax: 0.10.0
libtpu: 0.0.40
codegen_flags: <defaults>
</compile_context>

<pallas_src>
from functools import partial

import jax
import jax.numpy as jnp
from jax.experimental import pallas as pl
from jax.experimental.pallas import tpu as pltpu


def _round_up(x, m):
    return ((x + m - 1) // m) * m


# ----------------------------------------------------------------------------
# Kernel: one batch tile of the whole MLP.
#   x_ref : [TB, in_pad]          f32 (concat([s, a]) zero-padded to in_pad)
#   w_ref : [in_pad + 2*wmax, wmax] bf16 packed weights
#             rows [0, in_pad)            : block-diag fused layer-1 weight
#             rows [in_pad, in_pad+wmax)  : layer-2 weight (zero-padded)
#             rows [in_pad+wmax, +2*wmax) : layer-3 weight (zero-padded)
#   b_ref : [5, wmax] f32
#             row 0: b1 (concat of obs/act biases), row 1: b2, row 2: b3,
#             row 3: final-layer weight as a row, row 4 col 0: final bias b4
#   out_ref: [TB, 1] f32
# ----------------------------------------------------------------------------
def critic_kernel(x_ref, w_ref, b_ref, out_ref, *, in_pad, wmax):
    x = x_ref[...].astype(jnp.bfloat16)

    w1 = w_ref[0:in_pad, :]
    w2 = w_ref[in_pad:in_pad + wmax, :]
    w3 = w_ref[in_pad + wmax:in_pad + 2 * wmax, :]

    b1 = b_ref[0:1, :]
    b2 = b_ref[1:2, :]
    b3 = b_ref[2:3, :]
    w4 = b_ref[3:4, :]
    b4 = b_ref[4:5, 0:1]

    # fused obs/act branch (block-diagonal weight): ReLU([s,a] @ W1 + [b_obs,b_act])
    h1 = jnp.maximum(
        jnp.dot(x, w1, preferred_element_type=jnp.float32) + b1, 0.0)
    # q_net layer 1
    h2 = jnp.maximum(
        jnp.dot(h1.astype(jnp.bfloat16), w2,
                preferred_element_type=jnp.float32) + b2, 0.0)
    # q_net layer 2
    h3 = jnp.maximum(
        jnp.dot(h2.astype(jnp.bfloat16), w3,
                preferred_element_type=jnp.float32) + b3, 0.0)

    # q_net layer 3 (N=1): VPU multiply + lane reduction instead of an MXU pass
    q = jnp.sum(h3 * w4, axis=-1, keepdims=True) + b4
    out_ref[...] = q.astype(out_ref.dtype)


# ----------------------------------------------------------------------------
# One-time parameter packing (done at init, not per call).
# ----------------------------------------------------------------------------
def pack_params(params):
    w_obs, b_obs = params["w_obs"], params["b_obs"]
    w_act, b_act = params["w_act"], params["b_act"]
    w2, b2 = params["w2"], params["b2"]
    w3, b3 = params["w3"], params["b3"]
    w4, b4 = params["w4"], params["b4"]

    obs_size, oh1 = w_obs.shape
    act_size, ah1 = w_act.shape
    in_dim = obs_size + act_size
    h1 = oh1 + ah1
    h2 = w2.shape[1]
    h3 = w3.shape[1]

    wmax = _round_up(max(h1, h2, h3), 8)
    in_pad = _round_up(in_dim, 8)

    # Block-diagonal fused first-layer weight: [in_pad, wmax]
    w1p = jnp.zeros((in_pad, wmax), jnp.float32)
    w1p = w1p.at[:obs_size, :oh1].set(w_obs)
    w1p = w1p.at[obs_size:in_dim, oh1:h1].set(w_act)

    w2p = jnp.zeros((wmax, wmax), jnp.float32).at[:h1, :h2].set(w2)
    w3p = jnp.zeros((wmax, wmax), jnp.float32).at[:h2, :h3].set(w3)

    w_pack = jnp.concatenate([w1p, w2p, w3p], axis=0).astype(jnp.bfloat16)

    b_pack = jnp.zeros((5, wmax), jnp.float32)
    b_pack = b_pack.at[0, :oh1].set(b_obs[0])
    b_pack = b_pack.at[0, oh1:h1].set(b_act[0])
    b_pack = b_pack.at[1, :h2].set(b2[0])
    b_pack = b_pack.at[2, :h3].set(b3[0])
    b_pack = b_pack.at[3, :h3].set(w4[:, 0])          # final weight as a row
    b_pack = b_pack.at[4, 0].set(b4[0, 0])            # final scalar bias

    return dict(w_pack=w_pack, b_pack=b_pack,
                in_dim=in_dim, in_pad=in_pad, wmax=wmax)


# ----------------------------------------------------------------------------
# Wrapper: batch-gridded pallas_call (jitted).
# ----------------------------------------------------------------------------
def make_critic_forward(packed, *, block_b=128):
    w_pack = packed["w_pack"]
    b_pack = packed["b_pack"]
    in_dim = packed["in_dim"]
    in_pad = packed["in_pad"]
    wmax = packed["wmax"]
    w_rows = w_pack.shape[0]
    b_rows = b_pack.shape[0]

    def forward(s, a):
        B = s.shape[0]
        x = jnp.concatenate([s, a], axis=1).astype(jnp.float32)
        if in_pad > in_dim:
            x = jnp.pad(x, ((0, 0), (0, in_pad - in_dim)))

        tb = min(block_b, _round_up(B, 8))
        b_padded = _round_up(B, tb)
        if b_padded > B:
            x = jnp.pad(x, ((0, b_padded - B), (0, 0)))
        grid = (b_padded // tb,)

        kernel = partial(critic_kernel, in_pad=in_pad, wmax=wmax)
        out = pl.pallas_call(
            kernel,
            out_shape=jax.ShapeDtypeStruct((b_padded, 1), jnp.float32),
            grid=grid,
            in_specs=[
                pl.BlockSpec((tb, in_pad), lambda i: (i, 0)),       # x tile
                pl.BlockSpec((w_rows, wmax), lambda i: (0, 0)),     # weights (resident)
                pl.BlockSpec((b_rows, wmax), lambda i: (0, 0)),     # biases  (resident)
            ],
            out_specs=pl.BlockSpec((tb, 1), lambda i: (i, 0)),
            compiler_params=pltpu.CompilerParams(
                dimension_semantics=("parallel",)),
        )(x, w_pack, b_pack)
        return out[:B]

    return jax.jit(forward)


# ----------------------------------------------------------------------------
# Parameter init (mimics nn.Linear's U(-1/sqrt(fan_in), 1/sqrt(fan_in)))
# and a pure-JAX reference of the PyTorch forward.
# ----------------------------------------------------------------------------
def init_params(key, obs_size, act_size, obs_hidden_1, act_hidden_1,
                hidden_2, hidden_3):
    def linear(k, fan_in, fan_out):
        kw, kb = jax.random.split(k)
        bound = 1.0 / jnp.sqrt(fan_in)
        w = jax.random.uniform(kw, (fan_in, fan_out), jnp.float32, -bound, bound)
        b = jax.random.uniform(kb, (1, fan_out), jnp.float32, -bound, bound)
        return w, b

    k1, k2, k3, k4, k5 = jax.random.split(key, 5)
    w_obs, b_obs = linear(k1, obs_size, obs_hidden_1)
    w_act, b_act = linear(k2, act_size, act_hidden_1)
    w2, b2 = linear(k3, obs_hidden_1 + act_hidden_1, hidden_2)
    w3, b3 = linear(k4, hidden_2, hidden_3)
    w4, b4 = linear(k5, hidden_3, 1)
    return dict(w_obs=w_obs, b_obs=b_obs, w_act=w_act, b_act=b_act,
                w2=w2, b2=b2, w3=w3, b3=b3, w4=w4, b4=b4)


def critic_ref(s, a, p):
    x_obs = jax.nn.relu(s @ p["w_obs"] + p["b_obs"])
    x_act = jax.nn.relu(a @ p["w_act"] + p["b_act"])
    x = jnp.concatenate([x_obs, x_act], axis=1)
    h2 = jax.nn.relu(x @ p["w2"] + p["b2"])
    h3 = jax.nn.relu(h2 @ p["w3"] + p["b3"])
    return h3 @ p["w4"] + p["b4"]


if __name__ == "__main__":
    # Small shapes consistent with the module; batch large enough to exercise
    # the batch grid (2 grid steps with block_b=32).
    B = 64
    obs_size, act_size = 16, 8
    obs_hidden_1, act_hidden_1 = 32, 32
    hidden_2, hidden_3 = 64, 32

    key = jax.random.PRNGKey(0)
    k_s, k_a, k_p = jax.random.split(key, 3)
    s = jax.random.normal(k_s, (B, obs_size), jnp.float32)
    a = jax.random.normal(k_a, (B, act_size), jnp.float32)
    params = init_params(k_p, obs_size, act_size, obs_hidden_1, act_hidden_1,
                         hidden_2, hidden_3)

    packed = pack_params(params)
    critic_forward = make_critic_forward(packed, block_b=32)

    q = critic_forward(s, a)
    q = jax.block_until_ready(q)

    q_ref = critic_ref(s, a, params)
    assert q.shape == (B, 1)
    # bf16 MXU operands (f32 accumulate) -> relaxed tolerance vs f32 reference.
    assert jnp.allclose(q, q_ref, atol=5e-2, rtol=5e-2), "mismatch vs reference"

    print("KERNEL_OK")
</pallas_src>

<mosaic_0001>
module attributes {stable_mosaic.version = 11 : i64} {
  func.func @critic_kernel(%arg0: i32, %arg1: memref<32x24xf32, #tpu.memory_space<vmem>>, %arg2: memref<152x64xbf16, #tpu.memory_space<vmem>>, %arg3: memref<5x64xf32, #tpu.memory_space<vmem>>, %arg4: memref<32x1xf32, #tpu.memory_space<vmem>>) attributes {dimension_semantics = [#tpu.dimension_semantics<parallel>], iteration_bounds = array<i64: 2>, scalar_prefetch = 0 : i64, scratch_operands = 0 : i64, tpu.core_type = #tpu.core_type<tc>, window_params = [{transform_indices = @transform_0, window_bounds = array<i64: 32, 24>}, {pipeline_mode = #tpu.pipeline_mode<synchronous>, transform_indices = @transform_1, window_bounds = array<i64: 152, 64>}, {pipeline_mode = #tpu.pipeline_mode<synchronous>, transform_indices = @transform_2, window_bounds = array<i64: 5, 64>}, {transform_indices = @transform_3, window_bounds = array<i64: 32, 1>}]} {
    %c0 = arith.constant 0 : index
    %c0_0 = arith.constant 0 : index
    %0 = vector.load %arg1[%c0, %c0_0] : memref<32x24xf32, #tpu.memory_space<vmem>>, vector<32x24xf32>
    %1 = arith.truncf %0 : vector<32x24xf32> to vector<32x24xbf16>
    %c0_1 = arith.constant 0 : index
    %c0_2 = arith.constant 0 : index
    %2 = vector.load %arg2[%c0_1, %c0_2] : memref<152x64xbf16, #tpu.memory_space<vmem>>, vector<24x64xbf16>
    %c24 = arith.constant 24 : index
    %c0_3 = arith.constant 0 : index
    %3 = vector.load %arg2[%c24, %c0_3] : memref<152x64xbf16, #tpu.memory_space<vmem>>, vector<64x64xbf16>
    %c88 = arith.constant 88 : index
    %c0_4 = arith.constant 0 : index
    %4 = vector.load %arg2[%c88, %c0_4] : memref<152x64xbf16, #tpu.memory_space<vmem>>, vector<64x64xbf16>
    %c0_5 = arith.constant 0 : index
    %c0_6 = arith.constant 0 : index
    %5 = vector.load %arg3[%c0_5, %c0_6] : memref<5x64xf32, #tpu.memory_space<vmem>>, vector<1x64xf32>
    %c1 = arith.constant 1 : index
    %c0_7 = arith.constant 0 : index
    %6 = vector.load %arg3[%c1, %c0_7] : memref<5x64xf32, #tpu.memory_space<vmem>>, vector<1x64xf32>
    %c2 = arith.constant 2 : index
    %c0_8 = arith.constant 0 : index
    %7 = vector.load %arg3[%c2, %c0_8] : memref<5x64xf32, #tpu.memory_space<vmem>>, vector<1x64xf32>
    %c3 = arith.constant 3 : index
    %c0_9 = arith.constant 0 : index
    %8 = vector.load %arg3[%c3, %c0_9] : memref<5x64xf32, #tpu.memory_space<vmem>>, vector<1x64xf32>
    %c4 = arith.constant 4 : index
    %c0_10 = arith.constant 0 : index
    %9 = vector.load %arg3[%c4, %c0_10] : memref<5x64xf32, #tpu.memory_space<vmem>>, vector<1x1xf32>
    %cst = arith.constant dense<0.000000e+00> : vector<32x64xf32>
    %10 = tpu.matmul %1, %2, %cst {dimension_numbers = #tpu.dot_dimension_numbers<[1], [0], [0], [1], [0, 0, 1, 1], [], []>} : vector<32x24xbf16>, vector<24x64xbf16>, vector<32x64xf32> -> vector<32x64xf32>
    %11 = vector.broadcast %5 : vector<1x64xf32> to vector<32x64xf32>
    %12 = arith.addf %10, %11 : vector<32x64xf32>
    %cst_11 = arith.constant 0.000000e+00 : f32
    %13 = vector.broadcast %cst_11 : f32 to vector<32x64xf32>
    %14 = arith.maximumf %12, %13 : vector<32x64xf32>
    %15 = arith.truncf %14 : vector<32x64xf32> to vector<32x64xbf16>
    %cst_12 = arith.constant dense<0.000000e+00> : vector<32x64xf32>
    %16 = tpu.matmul %15, %3, %cst_12 {dimension_numbers = #tpu.dot_dimension_numbers<[1], [0], [0], [1], [0, 0, 1, 1], [], []>} : vector<32x64xbf16>, vector<64x64xbf16>, vector<32x64xf32> -> vector<32x64xf32>
    %17 = vector.broadcast %6 : vector<1x64xf32> to vector<32x64xf32>
    %18 = arith.addf %16, %17 : vector<32x64xf32>
    %cst_13 = arith.constant 0.000000e+00 : f32
    %19 = vector.broadcast %cst_13 : f32 to vector<32x64xf32>
    %20 = arith.maximumf %18, %19 : vector<32x64xf32>
    %21 = arith.truncf %20 : vector<32x64xf32> to vector<32x64xbf16>
    %cst_14 = arith.constant dense<0.000000e+00> : vector<32x64xf32>
    %22 = tpu.matmul %21, %4, %cst_14 {dimension_numbers = #tpu.dot_dimension_numbers<[1], [0], [0], [1], [0, 0, 1, 1], [], []>} : vector<32x64xbf16>, vector<64x64xbf16>, vector<32x64xf32> -> vector<32x64xf32>
    %23 = vector.broadcast %7 : vector<1x64xf32> to vector<32x64xf32>
    %24 = arith.addf %22, %23 : vector<32x64xf32>
    %cst_15 = arith.constant 0.000000e+00 : f32
    %25 = vector.broadcast %cst_15 : f32 to vector<32x64xf32>
    %26 = arith.maximumf %24, %25 : vector<32x64xf32>
    %27 = vector.broadcast %8 : vector<1x64xf32> to vector<32x64xf32>
    %28 = arith.mulf %26, %27 : vector<32x64xf32>
    %cst_16 = arith.constant dense<0.000000e+00> : vector<32xf32>
    %29 = vector.multi_reduction <add>, %28, %cst_16 [1] : vector<32x64xf32> to vector<32xf32>
    %30 = vector.shape_cast %29 : vector<32xf32> to vector<32x1xf32>
    %31 = vector.broadcast %9 : vector<1x1xf32> to vector<32x1xf32>
    %32 = arith.addf %30, %31 : vector<32x1xf32>
    %c0_17 = arith.constant 0 : index
    %c0_18 = arith.constant 0 : index
    %33 = vector.load %arg4[%c0_17, %c0_18] : memref<32x1xf32, #tpu.memory_space<vmem>>, vector<32x1xf32>
    tpu.vector_store %arg4[%c0_17, %c0_18], %32 {strides = array<i32>} : memref<32x1xf32, #tpu.memory_space<vmem>>, vector<32x1xf32>,
    return
  }
  func.func @transform_0(%arg0: i32) -> (i32, i32) {
    %c0_i32 = arith.constant 0 : i32
    %c0_i32_0 = arith.constant 0 : i32
    return %arg0, %c0_i32 : i32, i32
  }
  func.func @transform_1(%arg0: i32) -> (i32, i32) {
    %c0_i32 = arith.constant 0 : i32
    %c0_i32_0 = arith.constant 0 : i32
    %c0_i32_1 = arith.constant 0 : i32
    return %c0_i32, %c0_i32_0 : i32, i32
  }
  func.func @transform_2(%arg0: i32) -> (i32, i32) {
    %c0_i32 = arith.constant 0 : i32
    %c0_i32_0 = arith.constant 0 : i32
    %c0_i32_1 = arith.constant 0 : i32
    return %c0_i32, %c0_i32_0 : i32, i32
  }
  func.func @transform_3(%arg0: i32) -> (i32, i32) {
    %c0_i32 = arith.constant 0 : i32
    %c0_i32_0 = arith.constant 0 : i32
    return %arg0, %c0_i32 : i32, i32
  }
}

</mosaic_0001>

<bundles_post_ra>
// kernel: forward.1
= control target key start
LH: loop header
LB: loop body
LE: loop exit
PB: predicated region body
PF: predicated region fallthrough
CT: control target
= control target key end

     0   :  { %s677_s12 = smov 0   ;;  %s754_s0 = inlined_call_operand.vmem [shape: f32[64,24], index: 0, kind: input, shape index: {}]   ;;  %s755_s1 = inlined_call_operand.vmem [shape: bf16[152,64], index: 1, kind: input, shape index: {}]   ;;  %s756_s2 = inlined_call_operand.vmem [shape: f32[5,64], index: 2, kind: input, shape index: {}]   ;;  %s757_s3 = inlined_call_operand.vmem [shape: f32[64,1], index: 3, kind: output, shape index: {}]  }
   0x1 LB: > { %s550_s13 = sadd.s32 4294967295, %s655_s12   ;;  %p554_p0 = scmp.ge.s32.totalorder %s655_s12, 1  ;;  %s655_s12 = sphi %s677_s12, %s13_s12  }
   0x2   : > { %p138_p1 = scmp.lt.s32.totalorder %s655_s12, 3 }
   0x4   : > { %p139_p2 = pnand %p554_p0, %p138_p1 }
   0x5   : > { %s555_s18 = sshll.u32 (!%p139_p2), %s550_s13, 2 }
   0x6   : > { %142 = sbr.rel (%p139_p2) target bundleno = 779 (0x30b), region = 32  ;;  %p163_p3 = scmp.lt.s32.totalorder (!%p139_p2), %s555_s18, 7 }
   0xb   : > { %v639_v0 = vld [vmem:[%s755_s1 + $0x8] ss:$0 sps:$4 sm:$0xff]   ;;  %vm225_vm0 = vcmask 1043456   ;;  %v640_v1 = vld [vmem:[%s755_s1] sm:$0xff]   ;;  %s759_s18 = smov (!%p163_p3, %s555_s18), 7  ;;  %vm218_vm1 = vcmask 195584  }
   0xc   : > { %630 = vmatprep.subr.msk.bf16.mxu0 %vm225_vm0, %v639_v0  ;;  %v227_v2 = vsel %vm225_vm0, %v639_v0, 0  ;;  %v641_v3 = vld [vmem:[%s755_s1 + $0x24] sm:$0xff]   ;;  %s556_s21 = sshll.u32 %s759_s18, 3  ;;  %v642_v10 = vld [vmem:[%s755_s1 + $0x1c] sm:$0xff]   ;;  %v643_v11 = vld [vmem:[%s755_s1 + $0x14] sm:$0xff]   ;;  %vm312_vm2 = vcmask 523264  }
   0xd   : > { %599 = vmatpush3.bf16.msra.mxu0 %v227_v2  ;;  %606 = vmatprep.subr.bf16.mxu1 %v641_v3  ;;  %s166_s24 = scalar_lea.vmem %s754_s0, %s556_s21  ;;  %v644_v12 = vld [vmem:[%s755_s1 + $0xc] sm:$0xff]   ;;  %v645_v13 = vld [vmem:[%s755_s1 + $0x44] sm:$0xff]   ;;  %v559_v16 = vld [vmem:[%s756_s2] ss:$0 sm:$0xff]  ;;  %s172_s25 = scalar_lea.vmem %s757_s3, %s556_s21  ;;  %vm489_vm3 = vcmask 7168  }
   0xe   : > { %600 = vmatprep.subr.bf16.mxu0 %v640_v1  ;;  %607 = vmatpush3.bf16.msra.mxu1 %v641_v3  ;;  %v175_v4 = vld [vmem:[%s166_s24] sm:$0xff]  ;;  %v176_v5 = vld [vmem:[%s166_s24 + $0x8] sm:$0xff]  ;;  %v177_v6 = vld [vmem:[%s166_s24 + $0x10] sm:$0xff] }
   0xf   : > { %v179_v7 = vpack.c.bf16 %v176_v5, %v175_v4  ;;  %v178_v8 = vld [vmem:[%s166_s24 + $0x18] sm:$0xff]  ;;  %608 = vmatprep.subr.bf16.mxu1 %v642_v10  ;;  %v648_v31 = vld [vmem:[%s755_s1 + $0x2c] sm:$0xff]   ;;  %v564_v34 = vld [vmem:[%s756_s2 + $0x1] ss:$0 sm:$0xff] }
  0x10   : > { %v180_v9 = vpack.c.bf16 %v178_v8, %v177_v6  ;;  %v646_v29 = vld [vmem:[%s755_s1 + $0x3c] sm:$0xff]   ;;  %v647_v30 = vld [vmem:[%s755_s1 + $0x34] sm:$0xff]   ;;  %v579_v6 = vld [vmem:[%s756_s2 + $0x4] ss:$0 sm:$0xff] }
  0x11   : > { %601 = vmatpush3.bf16.msra.mxu0 %v640_v1  ;;  %602 = vmatprep.mubr.msk.bf16.mxu0 %vm218_vm1, %v179_v7  ;;  %v571_v47 = vld [vmem:[%s756_s2 + $0x2] ss:$0 sm:$0xff]  ;;  %v578_v51 = vld [vmem:[%s756_s2 + $0x3] ss:$0 sm:$0xff] }
  0x12   : > { %609 = vmatpush3.bf16.msra.mxu1 %v642_v10  ;;  %618 = vmatprep.subr.bf16.mxu0 %v645_v13 }
  0x13   : > { %610 = vmatprep.subr.bf16.mxu1 %v643_v11 }
  0x14   : > { %603 = vmatmul.mubr.msk.bf16.vlgmr.msra.gmra.mxu0 %vm218_vm1, %v180_v9 }
  0x15   : > { %619 = vmatpush3.bf16.msra.mxu0 %v645_v13 }
  0x16   : > { %611 = vmatpush3.bf16.msra.mxu1 %v643_v11  ;;  %620 = vmatprep.subr.bf16.mxu0 %v646_v29 }
  0x17   : > { %612 = vmatprep.subr.bf16.mxu1 %v644_v12 }
  0x19   : > { %621 = vmatpush3.bf16.msra.mxu0 %v646_v29 }
  0x1a   : > { %613 = vmatpush3.bf16.msra.mxu1 %v644_v12  ;;  %622 = vmatprep.subr.bf16.mxu0 %v647_v30 }
  0x1d   : > { %623 = vmatpush3.bf16.msra.mxu0 %v647_v30 }
  0x1e   : > { %624 = vmatprep.subr.bf16.mxu0 %v648_v31 }
  0x21   : > { %625 = vmatpush3.bf16.msra.mxu0 %v648_v31 }
  0xd4   : > { %v604_v14 = vpop.f32.mrf.mxu0 }
  0xd5   : > { %v272_v20 = vadd.f32 %v604_v14, %v559_v16 }
  0xd6   : > { %v263_v15 = vpop.f32.mrf.mxu0 }
  0xd7   : > { %v264_v18 = vadd.f32 %v559_v16, %v263_v15  ;;  %v280_v26 = vmax.f32 %v272_v20, 0.0 }
  0xd8   : > { %v605_v17 = vpop.f32.mrf.mxu0 }
  0xd9   : > { %v275_v19 = vadd.f32 %v605_v17, %v559_v16  ;;  %v278_v24 = vmax.f32 %v264_v18, 0.0 }
  0xda   : > { %v266_v21 = vpop.f32.mrf.mxu0 }
  0xdb   : > { %v267_v22 = vadd.f32 %v559_v16, %v266_v21  ;;  %v281_v23 = vmax.f32 %v275_v19, 0.0 }
  0xdd   : > { %v279_v25 = vmax.f32 %v267_v22, 0.0  ;;  %v283_v28 = vpack.c.bf16 %v281_v23, %v280_v26 }
  0xdf   : > { %v282_v27 = vpack.c.bf16 %v279_v25, %v278_v24 }
  0xe1   : > { %614 = vmatprep.mubr.msk.bf16.mxu1 %vm312_vm2, %v282_v27 }
  0xe2   : > { %615 = vmatmul.mubr.msk.bf16.vlgmr.msra.gmra.mxu1 %vm312_vm2, %v283_v28 }
 0x1a2   : > { %v616_v32 = vpop.f32.mrf.mxu1 }
 0x1a3   : > { %v362_v38 = vadd.f32 %v616_v32, %v564_v34 }
 0x1a4   : > { %v353_v33 = vpop.f32.mrf.mxu1 }
 0x1a5   : > { %v354_v36 = vadd.f32 %v564_v34, %v353_v33  ;;  %v370_v44 = vmax.f32 %v362_v38, 0.0 }
 0x1a6   : > { %v617_v35 = vpop.f32.mrf.mxu1 }
 0x1a7   : > { %v365_v37 = vadd.f32 %v617_v35, %v564_v34  ;;  %v368_v42 = vmax.f32 %v354_v36, 0.0 }
 0x1a8   : > { %v356_v39 = vpop.f32.mrf.mxu1 }
 0x1a9   : > { %v357_v40 = vadd.f32 %v564_v34, %v356_v39  ;;  %v371_v41 = vmax.f32 %v365_v37, 0.0 }
 0x1ab   : > { %v369_v43 = vmax.f32 %v357_v40, 0.0  ;;  %v373_v46 = vpack.c.bf16 %v371_v41, %v370_v44 }
 0x1ad   : > { %v372_v45 = vpack.c.bf16 %v369_v43, %v368_v42 }
 0x1af   : > { %626 = vmatprep.mubr.msk.bf16.mxu0 %vm312_vm2, %v372_v45 }
 0x1b0   : > { %627 = vmatmul.mubr.msk.bf16.vlgmr.msra.gmra.mxu0 %vm312_vm2, %v373_v46 }
 0x270   : > { %v628_v48 = vpop.f32.mrf.mxu0 }
 0x271   : > { %v451_v49 = vadd.f32 %v628_v48, %v571_v47 }
 0x272   : > { %v442_v50 = vpop.f32.mrf.mxu0 }
 0x273   : > { %v459_v52 = vmax.f32 %v451_v49, 0.0  ;;  %v443_v53 = vadd.f32 %v571_v47, %v442_v50 }
 0x274   : > { %v629_v54 = vpop.f32.mrf.mxu0 }
 0x275   : > { %v457_v55 = vmax.f32 %v443_v53, 0.0  ;;  %v454_v56 = vadd.f32 %v629_v54, %v571_v47  ;;  %v467_v57 = vmul.f32 %v578_v51, %v459_v52 }
 0x276   : > { %v445_v58 = vpop.f32.mrf.mxu0 }
 0x277   : > { %v460_v59 = vmax.f32 %v454_v56, 0.0  ;;  %v446_v60 = vadd.f32 %v571_v47, %v445_v58  ;;  %v475_v61 = vsel %vm312_vm2, %v467_v57, 0.0  ;;  %v465_v62 = vmul.f32 %v578_v51, %v457_v55 }
 0x278   : > { %476 = vadd.xlane.f32.xlu1 %v475_v61 }
 0x279   : > { %v458_v63 = vmax.f32 %v446_v60, 0.0  ;;  %v469_v0 = vsel %vm312_vm2, %v465_v62, 0.0  ;;  %v468_v1 = vmul.f32 %v578_v51, %v460_v59 }
 0x27a   : > { %470 = vadd.xlane.f32.xlu0 %v469_v0 }
 0x27b   : > { %v478_v2 = vsel %vm312_vm2, %v468_v1, 0.0  ;;  %v466_v3 = vmul.f32 %v578_v51, %v458_v63 }
 0x27c   : > { %479 = vadd.xlane.f32.xlu1 %v478_v2 }
 0x27d   : > { %v472_v4 = vsel %vm312_vm2, %v466_v3, 0.0 }
 0x27e   : > { %473 = vadd.xlane.f32.xlu0 %v472_v4 }
 0x301   : > { %v477_v5 = vpop.xlane.xlu1 %476 }
 0x302   : > { %v487_v12 = vadd.f32 %v579_v6, %v477_v5 }
 0x303   : > { %v471_v7 = vpop.xlane.xlu0 %470 }
 0x304   : > { %v485_v8 = vadd.f32 %v579_v6, %v471_v7  ;;  %492 = vst.msk [vmem:[%s172_s25 + $0x10] sm:$0xff] %vm489_vm3, %v487_v12 }
 0x305   : > { %v480_v9 = vpop.xlane.xlu1 %479 }
 0x306   : > { %490 = vst.msk [vmem:[%s172_s25] sm:$0xff] %vm489_vm3, %v485_v8  ;;  %v488_v13 = vadd.f32 %v579_v6, %v480_v9 }
 0x307   : > { %v474_v10 = vpop.xlane.xlu0 %473 }
 0x308   : > { %v486_v11 = vadd.f32 %v579_v6, %v474_v10  ;;  %493 = vst.msk [vmem:[%s172_s25 + $0x18] sm:$0xff] %vm489_vm3, %v488_v13 }
 0x30a   : > { %491 = vst.msk [vmem:[%s172_s25 + $0x8] sm:$0xff] %vm489_vm3, %v486_v11 }
 0x30b PF: > { %s13_s12 = sadd.s32 1, %s655_s12  }
 0x30c   : > { %p10_p4 = scmp.ge.s32.totalorder %s13_s12, 4  }
 0x30e   :  { %12 = sbr.rel (!%p10_p4) target bundleno = 1 (0x1), region = 62 }

</bundles_post_ra>
